<compile_context>
chip_gen: v7x
topology: tpu7x:2x2x1
jax: 0.10.0
libtpu: 0.0.40
codegen_flags: <defaults>
</compile_context>

<pallas_src>
import functools

import jax
import jax.numpy as jnp
from jax.experimental import pallas as pl
from jax.experimental.pallas import tpu as pltpu

_LANES = 128


def _wrmse_ps_kernel(n_ref, scale_ref, y_ref, yp_ref, sum_ref, gmax_ref, *,
                     tile_rows):
    """One grid step processes a (tile_rows, 128) slab of normalized energies."""
    p = pl.program_id(0)           # TensorCore split ("parallel")
    i = pl.program_id(1)           # streaming reduction axis ("arbitrary")
    steps = pl.num_programs(1)

    @pl.when(i == 0)
    def _init():
        sum_ref[...] = jnp.zeros_like(sum_ref)
        # Valid weights are strictly positive (Ehat >= Emax > 0) -> 0 is safe.
        gmax_ref[...] = jnp.zeros_like(gmax_ref)

    n = n_ref[0]
    y_mean = scale_ref[0]
    y_std = scale_ref[1]
    emax = scale_ref[2]

    y = y_ref[...].astype(jnp.float32)
    yp = yp_ref[...].astype(jnp.float32)

    yd = y * y_std + y_mean                      # de-normalized energies
    diff = (y - yp) * y_std                      # == yd - yd_pred (fused)

    ehat = jnp.maximum(yd, emax)
    # Unnormalized PS weight; the 1/(2.002002002*1e-4) constant cancels in
    # w / w.max(), so it is dropped (single exact reciprocal, HBM-bound kernel).
    g = (jnp.tanh(jnp.float32(-0.0006) * (ehat - emax))
         + jnp.float32(1.002002002)) * pl.reciprocal(ehat, approx=False)

    # Ragged-tail / out-of-bounds-block mask: keep global element index < n.
    # r0 uses the UNclamped block index, so clamped duplicate blocks mask to 0,
    # and garbage from partially-OOB block reads never reaches the accumulators.
    r0 = (p * steps + i) * tile_rows
    lim = n - r0 * _LANES                        # valid elements in this tile
    row_i = jax.lax.broadcasted_iota(jnp.int32, (tile_rows, _LANES), 0)
    lane_i = jax.lax.broadcasted_iota(jnp.int32, (tile_rows, _LANES), 1)
    valid = (row_i * _LANES + lane_i) < lim

    g = jnp.where(valid, g, 0.0)
    wd2 = jnp.where(valid, g * diff * diff, 0.0)

    # (tile_rows,128) -> (8,128): leading-axis reduction after a tile-aligned
    # reshape -> pure vreg-wise VALU adds / maxes, unmasked full-vreg stores.
    wd2_v = wd2.reshape(tile_rows // 8, 8, _LANES)
    g_v = g.reshape(tile_rows // 8, 8, _LANES)
    sum_ref[0] = sum_ref[0] + jnp.sum(wd2_v, axis=0)
    gmax_ref[0] = jnp.maximum(gmax_ref[0], jnp.max(g_v, axis=0))


def _chip_defaults():
    """(num_splits, tile_rows): 2 TCs + bigger tiles on v7x, 1 TC elsewhere."""
    try:
        kind = jax.devices()[0].device_kind.lower()
    except Exception:
        kind = ""
    is_v7 = ("v7" in kind) or ("7x" in kind) or ("tpu7" in kind)
    return (2, 4096) if is_v7 else (1, 2048)


def wrmse_loss_ps(y, y_pred, y_mean, y_std, Emax=2000.0,
                  tile_rows=None, num_splits=None):
    """Pallas implementation of WRMSELoss_PS.forward.  y, y_pred: (N,)."""
    assert y.shape == y_pred.shape and y.ndim == 1
    n = y.shape[0]

    if y.dtype not in (jnp.float32, jnp.bfloat16):
        y = y.astype(jnp.float32)
    if y_pred.dtype != y.dtype:
        y_pred = y_pred.astype(y.dtype)

    d_splits, d_tile = _chip_defaults()
    if num_splits is None:
        num_splits = d_splits
    if tile_rows is None:
        tile_rows = d_tile

    # Lane-dense 2-D view.  n % 128 == 0  ->  free reshape, no copy.
    # Otherwise pad the last 128-lane row with zeros (masked in-kernel).
    rows = -(-n // _LANES)
    if rows * _LANES != n:
        pad = jnp.zeros((rows * _LANES - n,), y.dtype)
        y = jnp.concatenate([y, pad])
        y_pred = jnp.concatenate([y_pred, pad])
    y2 = y.reshape(rows, _LANES)
    yp2 = y_pred.reshape(rows, _LANES)

    # Grid sizing.  tile_rows kept a multiple of 16 (valid f32 & bf16 tiling);
    # shrink splits / tiles for small inputs.
    if rows < num_splits * 16:
        num_splits = 1
    per_split = -(-rows // num_splits)
    tile_rows = max(16, min(tile_rows, -(-per_split // 16) * 16))
    steps = -(-per_split // tile_rows)
    n_blocks = -(-rows // tile_rows)            # real blocks in the array
    last_block = n_blocks - 1

    # Only the last split can generate block indices past the end; clamp them
    # (their contribution is already zeroed by the element-index mask).
    if num_splits * steps > n_blocks:
        def data_idx(p, i):
            return (jnp.minimum(p * steps + i, last_block), 0)
    else:
        def data_idx(p, i):
            return (p * steps + i, 0)

    smem_spec = pl.BlockSpec(memory_space=pltpu.MemorySpace.SMEM)
    data_spec = pl.BlockSpec((tile_rows, _LANES), data_idx)
    acc_spec = pl.BlockSpec((1, 8, _LANES), lambda p, i: (p, 0, 0))

    n_arr = jnp.asarray([n], jnp.int32)
    scale_arr = jnp.concatenate(
        [jnp.asarray(v, jnp.float32).reshape(1) for v in (y_mean, y_std, Emax)])

    kernel = functools.partial(_wrmse_ps_kernel, tile_rows=tile_rows)
    sums, gmaxs = pl.pallas_call(
        kernel,
        out_shape=(jax.ShapeDtypeStruct((num_splits, 8, _LANES), jnp.float32),
                   jax.ShapeDtypeStruct((num_splits, 8, _LANES), jnp.float32)),
        grid=(num_splits, steps),
        in_specs=[smem_spec, smem_spec, data_spec, data_spec],
        out_specs=(acc_spec, acc_spec),
        compiler_params=pltpu.CompilerParams(
            dimension_semantics=("parallel", "arbitrary")),
    )(n_arr, scale_arr, y2, yp2)

    total = jnp.sum(sums)
    g_max = jnp.max(gmaxs)
    # mean((w / w.max()) * diff^2) == sum(g*diff^2) / (n * max(g))
    wmse = total / (g_max * jnp.float32(n))
    return jnp.sqrt(wmse)


def _wrmse_loss_ps_ref(y, y_pred, y_mean, y_std, Emax=2000.0):
    """Pure-JAX reference mirroring the PyTorch forward exactly."""
    yd = y * y_std + y_mean
    yd_pred = y_pred * y_std + y_mean
    N = 1e-4
    ehat = jnp.maximum(yd, Emax)
    w = (jnp.tanh(-0.0006 * (ehat - Emax)) + 1.002002002) / 2.002002002 / N / ehat
    w = w / jnp.max(w)
    wmse = jnp.mean(w * (yd - yd_pred) ** 2)
    return jnp.sqrt(wmse)


if __name__ == "__main__":
    key = jax.random.PRNGKey(0)
    # Deterministic "set_scale" parameters (module __init__ / set_scale):
    y_mean, y_std, Emax = 1500.0, 800.0, 2000.0

    def check(n, dtype=jnp.float32, **kw):
        ka, kb = jax.random.split(jax.random.fold_in(key, n))
        yf = jax.random.normal(ka, (n,), jnp.float32)
        ypf = yf + 0.05 * jax.random.normal(kb, (n,), jnp.float32)
        y = yf.astype(dtype)
        yp = ypf.astype(dtype)
        out = jax.block_until_ready(wrmse_loss_ps(y, yp, y_mean, y_std, Emax, **kw))
        ref = _wrmse_loss_ps_ref(y.astype(jnp.float32), yp.astype(jnp.float32),
                                 y_mean, y_std, Emax)
        assert jnp.allclose(out, ref, rtol=1e-5, atol=1e-6), (n, dtype, out, ref)

    check(4096)                                   # N % 128 == 0: zero-copy path
    check(5000)                                   # ragged N: pad-to-128 + in-kernel mask
    check(80 * _LANES, tile_rows=32, num_splits=2)  # 2-split grid w/ clamped OOB block
    check(4096, dtype=jnp.bfloat16)               # bf16 ingestion, f32 accumulation
    print("KERNEL_OK")
</pallas_src>

<mosaic_0001>
module attributes {stable_mosaic.version = 11 : i64} {
  func.func @_wrmse_ps_kernel(%arg0: i32, %arg1: i32, %arg2: memref<1xi32, #tpu.memory_space<smem>>, %arg3: memref<3xf32, #tpu.memory_space<smem>>, %arg4: memref<32x128xf32, #tpu.memory_space<vmem>>, %arg5: memref<32x128xf32, #tpu.memory_space<vmem>>, %arg6: memref<1x8x128xf32, #tpu.memory_space<vmem>>, %arg7: memref<1x8x128xf32, #tpu.memory_space<vmem>>) attributes {dimension_semantics = [#tpu.dimension_semantics<parallel>, #tpu.dimension_semantics<arbitrary>], iteration_bounds = array<i64: 1, 1>, scalar_prefetch = 0 : i64, scratch_operands = 0 : i64, tpu.core_type = #tpu.core_type<tc>, window_params = [{transform_indices = @transform_0, window_bounds = array<i64: 1>}, {transform_indices = @transform_1, window_bounds = array<i64: 3>}, {transform_indices = @transform_2, window_bounds = array<i64: 32, 128>}, {transform_indices = @transform_3, window_bounds = array<i64: 32, 128>}, {transform_indices = @transform_4, window_bounds = array<i64: 1, 8, 128>}, {transform_indices = @transform_5, window_bounds = array<i64: 1, 8, 128>}]} {
    %c0_i32 = arith.constant 0 : i32
    %0 = arith.cmpi eq, %arg1, %c0_i32 : i32
    %1 = arith.extui %0 : i1 to i32
    %c0_i32_0 = arith.constant 0 : i32
    %2 = arith.cmpi ne, %1, %c0_i32_0 : i32
    scf.if %2 {
      %cst_24 = arith.constant 0.000000e+00 : f32
      %61 = vector.broadcast %cst_24 : f32 to vector<1x8x128xf32>
      %c0_25 = arith.constant 0 : index
      %c0_26 = arith.constant 0 : index
      %c0_27 = arith.constant 0 : index
      %62 = vector.load %arg6[%c0_25, %c0_26, %c0_27] : memref<1x8x128xf32, #tpu.memory_space<vmem>>, vector<1x8x128xf32>
      tpu.vector_store %arg6[%c0_25, %c0_26, %c0_27], %61 {strides = array<i32>} : memref<1x8x128xf32, #tpu.memory_space<vmem>>, vector<1x8x128xf32>,
      %cst_28 = arith.constant 0.000000e+00 : f32
      %63 = vector.broadcast %cst_28 : f32 to vector<1x8x128xf32>
      %c0_29 = arith.constant 0 : index
      %c0_30 = arith.constant 0 : index
      %c0_31 = arith.constant 0 : index
      %64 = vector.load %arg7[%c0_29, %c0_30, %c0_31] : memref<1x8x128xf32, #tpu.memory_space<vmem>>, vector<1x8x128xf32>
      tpu.vector_store %arg7[%c0_29, %c0_30, %c0_31], %63 {strides = array<i32>} : memref<1x8x128xf32, #tpu.memory_space<vmem>>, vector<1x8x128xf32>,
    } else {
    }
    %c0 = arith.constant 0 : index
    %3 = memref.load %arg2[%c0] : memref<1xi32, #tpu.memory_space<smem>>
    %c0_1 = arith.constant 0 : index
    %4 = memref.load %arg3[%c0_1] : memref<3xf32, #tpu.memory_space<smem>>
    %c1 = arith.constant 1 : index
    %5 = memref.load %arg3[%c1] : memref<3xf32, #tpu.memory_space<smem>>
    %c2 = arith.constant 2 : index
    %6 = memref.load %arg3[%c2] : memref<3xf32, #tpu.memory_space<smem>>
    %c0_2 = arith.constant 0 : index
    %c0_3 = arith.constant 0 : index
    %7 = vector.load %arg4[%c0_2, %c0_3] : memref<32x128xf32, #tpu.memory_space<vmem>>, vector<32x128xf32>
    %c0_4 = arith.constant 0 : index
    %c0_5 = arith.constant 0 : index
    %8 = vector.load %arg5[%c0_4, %c0_5] : memref<32x128xf32, #tpu.memory_space<vmem>>, vector<32x128xf32>
    %9 = vector.broadcast %5 : f32 to vector<32x128xf32>
    %10 = arith.mulf %7, %9 : vector<32x128xf32>
    %11 = vector.broadcast %4 : f32 to vector<32x128xf32>
    %12 = arith.addf %10, %11 : vector<32x128xf32>
    %13 = arith.subf %7, %8 : vector<32x128xf32>
    %14 = vector.broadcast %5 : f32 to vector<32x128xf32>
    %15 = arith.mulf %13, %14 : vector<32x128xf32>
    %16 = vector.broadcast %6 : f32 to vector<32x128xf32>
    %17 = arith.maximumf %12, %16 : vector<32x128xf32>
    %18 = vector.broadcast %6 : f32 to vector<32x128xf32>
    %19 = arith.subf %17, %18 : vector<32x128xf32>
    %cst = arith.constant -6.000000e-04 : f32
    %20 = vector.broadcast %cst : f32 to vector<32x128xf32>
    %21 = arith.mulf %20, %19 : vector<32x128xf32>
    %22 = math.tanh %21 : vector<32x128xf32>
    %cst_6 = arith.constant 1.002002 : f32
    %23 = vector.broadcast %cst_6 : f32 to vector<32x128xf32>
    %24 = arith.addf %22, %23 : vector<32x128xf32>
    %25 = tpu.reciprocal %17 : vector<32x128xf32> -> vector<32x128xf32>
    %26 = arith.mulf %24, %25 : vector<32x128xf32>
    %c1_i32 = arith.constant 1 : i32
    %27 = arith.muli %arg0, %c1_i32 : i32
    %28 = arith.addi %27, %arg1 : i32
    %c32_i32 = arith.constant 32 : i32
    %29 = arith.muli %28, %c32_i32 : i32
    %c128_i32 = arith.constant 128 : i32
    %30 = arith.muli %29, %c128_i32 : i32
    %31 = arith.subi %3, %30 : i32
    %32 = tpu.iota {dimensions = array<i32: 0>} : vector<32x128xi32>
    %33 = tpu.iota {dimensions = array<i32: 1>} : vector<32x128xi32>
    %c128_i32_7 = arith.constant 128 : i32
    %34 = vector.broadcast %c128_i32_7 : i32 to vector<32x128xi32>
    %35 = arith.muli %32, %34 : vector<32x128xi32>
    %36 = arith.addi %35, %33 : vector<32x128xi32>
    %37 = vector.broadcast %31 : i32 to vector<32x128xi32>
    %38 = arith.cmpi slt, %36, %37 : vector<32x128xi32>
    %cst_8 = arith.constant 0.000000e+00 : f32
    %39 = vector.broadcast %cst_8 : f32 to vector<32x128xf32>
    %40 = arith.select %38, %26, %39 : vector<32x128xi1>, vector<32x128xf32>
    %41 = arith.mulf %40, %15 : vector<32x128xf32>
    %42 = arith.mulf %41, %15 : vector<32x128xf32>
    %cst_9 = arith.constant 0.000000e+00 : f32
    %43 = vector.broadcast %cst_9 : f32 to vector<32x128xf32>
    %44 = arith.select %38, %42, %43 : vector<32x128xi1>, vector<32x128xf32>
    %45 = vector.shape_cast %44 : vector<32x128xf32> to vector<4x8x128xf32>
    %46 = vector.shape_cast %40 : vector<32x128xf32> to vector<4x8x128xf32>
    %c0_10 = arith.constant 0 : index
    %c0_11 = arith.constant 0 : index
    %c0_12 = arith.constant 0 : index
    %47 = vector.load %arg6[%c0_10, %c0_11, %c0_12] : memref<1x8x128xf32, #tpu.memory_space<vmem>>, vector<1x8x128xf32>
    %48 = vector.shape_cast %47 : vector<1x8x128xf32> to vector<8x128xf32>
    %cst_13 = arith.constant dense<0.000000e+00> : vector<8x128xf32>
    %49 = vector.multi_reduction <add>, %45, %cst_13 [0] : vector<4x8x128xf32> to vector<8x128xf32>
    %50 = arith.addf %48, %49 : vector<8x128xf32>
    %c0_14 = arith.constant 0 : index
    %c0_15 = arith.constant 0 : index
    %c0_16 = arith.constant 0 : index
    %51 = vector.load %arg6[%c0_14, %c0_15, %c0_16] : memref<1x8x128xf32, #tpu.memory_space<vmem>>, vector<1x8x128xf32>
    %52 = vector.shape_cast %51 : vector<1x8x128xf32> to vector<8x128xf32>
    %53 = vector.shape_cast %50 : vector<8x128xf32> to vector<1x8x128xf32>
    tpu.vector_store %arg6[%c0_14, %c0_15, %c0_16], %53 {strides = array<i32>} : memref<1x8x128xf32, #tpu.memory_space<vmem>>, vector<1x8x128xf32>,
    %c0_17 = arith.constant 0 : index
    %c0_18 = arith.constant 0 : index
    %c0_19 = arith.constant 0 : index
    %54 = vector.load %arg7[%c0_17, %c0_18, %c0_19] : memref<1x8x128xf32, #tpu.memory_space<vmem>>, vector<1x8x128xf32>
    %55 = vector.shape_cast %54 : vector<1x8x128xf32> to vector<8x128xf32>
    %cst_20 = arith.constant dense<0xFF800000> : vector<8x128xf32>
    %56 = vector.multi_reduction <maximumf>, %46, %cst_20 [0] : vector<4x8x128xf32> to vector<8x128xf32>
    %57 = arith.maximumf %55, %56 : vector<8x128xf32>
    %c0_21 = arith.constant 0 : index
    %c0_22 = arith.constant 0 : index
    %c0_23 = arith.constant 0 : index
    %58 = vector.load %arg7[%c0_21, %c0_22, %c0_23] : memref<1x8x128xf32, #tpu.memory_space<vmem>>, vector<1x8x128xf32>
    %59 = vector.shape_cast %58 : vector<1x8x128xf32> to vector<8x128xf32>
    %60 = vector.shape_cast %57 : vector<8x128xf32> to vector<1x8x128xf32>
    tpu.vector_store %arg7[%c0_21, %c0_22, %c0_23], %60 {strides = array<i32>} : memref<1x8x128xf32, #tpu.memory_space<vmem>>, vector<1x8x128xf32>,
    return
  }
  func.func @transform_0(%arg0: i32, %arg1: i32) -> i32 {
    %c0_i32 = arith.constant 0 : i32
    %c0_i32_0 = arith.constant 0 : i32
    return %c0_i32 : i32
  }
  func.func @transform_1(%arg0: i32, %arg1: i32) -> i32 {
    %c0_i32 = arith.constant 0 : i32
    %c0_i32_0 = arith.constant 0 : i32
    return %c0_i32 : i32
  }
  func.func @transform_2(%arg0: i32, %arg1: i32) -> (i32, i32) {
    %c1_i32 = arith.constant 1 : i32
    %0 = arith.muli %arg0, %c1_i32 : i32
    %1 = arith.addi %0, %arg1 : i32
    %c0_i32 = arith.constant 0 : i32
    %c0_i32_0 = arith.constant 0 : i32
    return %1, %c0_i32 : i32, i32
  }
  func.func @transform_3(%arg0: i32, %arg1: i32) -> (i32, i32) {
    %c1_i32 = arith.constant 1 : i32
    %0 = arith.muli %arg0, %c1_i32 : i32
    %1 = arith.addi %0, %arg1 : i32
    %c0_i32 = arith.constant 0 : i32
    %c0_i32_0 = arith.constant 0 : i32
    return %1, %c0_i32 : i32, i32
  }
  func.func @transform_4(%arg0: i32, %arg1: i32) -> (i32, i32, i32) {
    %c0_i32 = arith.constant 0 : i32
    %c0_i32_0 = arith.constant 0 : i32
    %c0_i32_1 = arith.constant 0 : i32
    return %arg0, %c0_i32, %c0_i32_0 : i32, i32, i32
  }
  func.func @transform_5(%arg0: i32, %arg1: i32) -> (i32, i32, i32) {
    %c0_i32 = arith.constant 0 : i32
    %c0_i32_0 = arith.constant 0 : i32
    %c0_i32_1 = arith.constant 0 : i32
    return %arg0, %c0_i32, %c0_i32_0 : i32, i32, i32
  }
}

</mosaic_0001>

<bundles_post_ra>
// kernel: tpu_custom_call.1
= control target key start
LH: loop header
LB: loop body
LE: loop exit
PB: predicated region body
PF: predicated region fallthrough
CT: control target
= control target key end

     0   :  { %12 = vsyncpa [#allocation6], 0  ;;  %s483_s0 = inlined_call_operand.<no memory space> [shape: s32[1], index: 0, kind: input, shape index: {}]   ;;  %s484_s1 = inlined_call_operand.vmem [shape: f32[3], index: 1, kind: input, shape index: {}]   ;;  %s485_s2 = inlined_call_operand.hbm [shape: f32[32,128], index: 2, kind: input, shape index: {}]   ;;  %s486_s3 = inlined_call_operand.hbm [shape: f32[32,128], index: 3, kind: input, shape index: {}]   ;;  %s487_s4 = inlined_call_operand.hbm [shape: f32[1,8,128], index: 4, kind: output, shape index: {0}]   ;;  %s488_s5 = inlined_call_operand.hbm [shape: f32[1,8,128], index: 5, kind: output, shape index: {1}]  }
   0x1   :  { %13 = vsyncpa [#allocation4], 0 }
   0x2   :  { %14 = vsyncpa [#allocation9], 0 }
   0x3   :  { %15 = vsyncpa [#allocation5], 0 }
   0x4   :  { %16 = vsyncpa [#allocation12], 0  ;;  %s25_s20 = sshll.u32 %s484_s1, 4  ;;  %s26_s20 = int_to_ptr.vmem [resolvable:$true] %s25_s20 }
   0x5   :  { %s248_s21 = scalar_lea.vmem %s26_s20, 16  ;;  %p253_p1 = scmp.lt.s32.totalorder %s26_s20, %s26_s20 }
   0x6   :  { %p249_p0 = scmp.ne.s32.totalorder %s26_s20, %s248_s21  ;;  %p254_p2 = scmp.lt.s32.totalorder %s248_s21, %s248_s21 }
   0x8   :  { %p255_p3 = por %p254_p2, %p253_p1 }
   0xa   :  { %p256_p4 = pnand %p255_p3, %p249_p0 }
   0xc   :  { %259 = shalt.err (!%p256_p4)
}
   0xd   :  { %s358_s22 = smov [#allocation3]   ;;  %s359_s23 = smov [#allocation7]  }
   0xe   :  { %28 = dma.vmem_to_smem %s26_s20, 16, %s358_s22, [#allocation6]  }
   0xf   :  { %s38_s24 = sshll.u32 %s359_s23, 4  ;;  %s260_s27 = scalar_lea.hbm %s485_s2, 512  ;;  %s39_s24 = int_to_ptr.vmem [resolvable:$true] %s38_s24 }
  0x10   :  { %p261_p5 = scmp.ne.s32.totalorder %s485_s2, %s260_s27  ;;  %p264_p6 = scmp.lt.u32.totalorder %s260_s27, %s485_s2 }
  0x12   :  { %p266_p7 = pnand %p264_p6, %p261_p5 }
  0x14   :  { %269 = shalt.err (!%p266_p7)
}
  0x15   :  { %s270_s6 = scalar_lea.vmem %s39_s24, 512  ;;  %p275_p9 = scmp.lt.s32.totalorder %s39_s24, %s39_s24 }
  0x16   :  { %p271_p8 = scmp.ne.s32.totalorder %s39_s24, %s270_s6  ;;  %p276_p10 = scmp.lt.s32.totalorder %s270_s6, %s270_s6 }
  0x18   :  { %p277_p11 = por %p276_p10, %p275_p9 }
  0x1a   :  { %p278_p12 = pnand %p277_p11, %p271_p8 }
  0x1c   :  { %281 = shalt.err (!%p278_p12)
}
  0x1d   :  { %s360_s7 = smov 128   ;;  %s361_s8 = smov 8  }
  0x1e   :  { %44 = dma.hbm_to_vmem [thread:$0]  %s485_s2, 512, %s39_s24, [#allocation4], %s360_s7, %s360_s7, %s361_s8  }
  0x1f   :  { %s362_s11 = smov [#allocation8]   ;;  %s282_s15 = scalar_lea.hbm %s486_s3, 512 }
  0x20   :  { %s54_s12 = sshll.u32 %s362_s11, 4  ;;  %p283_p13 = scmp.ne.s32.totalorder %s486_s3, %s282_s15  ;;  %s55_s12 = int_to_ptr.vmem [resolvable:$true] %s54_s12 }
  0x21   :  { %p286_p0 = scmp.lt.u32.totalorder %s282_s15, %s486_s3 }
  0x23   :  { %p288_p1 = pnand %p286_p0, %p283_p13 }
  0x25   :  { %291 = shalt.err (!%p288_p1)
}
  0x26   :  { %s292_s20 = scalar_lea.vmem %s55_s12, 512  ;;  %p297_p3 = scmp.lt.s32.totalorder %s55_s12, %s55_s12 }
  0x27   :  { %p293_p2 = scmp.ne.s32.totalorder %s55_s12, %s292_s20  ;;  %p298_p4 = scmp.lt.s32.totalorder %s292_s20, %s292_s20 }
  0x29   :  { %p299_p5 = por %p298_p4, %p297_p3 }
  0x2b   :  { %p300_p6 = pnand %p299_p5, %p293_p2 }
  0x2d   :  { %303 = shalt.err (!%p300_p6)
}
  0x2e   :  { %60 = dma.hbm_to_vmem [thread:$0]  %s486_s3, 512, %s55_s12, [#allocation9], %s360_s7, %s360_s7, %s361_s8  }
  0x2f   :  { %348 = dma.done.wait [#allocation6], 16  }
  0x30   :  { %349 = vsyncadd [#allocation6], 4294967280 }
  0x31   :  { %350 = dma.done.wait [#allocation4], 512  }
  0x32   :  { %351 = vsyncadd [#allocation4], 4294966784 }
  0x33   :  { %352 = dma.done.wait [#allocation9], 512  }
  0x34   :  { %353 = vsyncadd [#allocation9], 4294966784 }
  0x35   :  { %70 = sfence }
  0x36   :  { %s82_s22 = sld [smem:[#allocation3]]  ;;  %s222_s23 = sld [smem:[#allocation3 + $0x1]]  ;;  %v422_v0 = vld [vmem:[#allocation7] sm:$0xff]  ;;  %v424_v1 = vld [vmem:[#allocation7 + $0x8] sm:$0xff]  ;;  %v426_v2 = vld [vmem:[#allocation7 + $0x10] sm:$0xff]  ;;  %v143_v15 = vlaneseq  ;;  %v158_v48 = vstv %s483_s0 }
  0x37   :  { %s223_s24 = sld [smem:[#allocation3 + $0x2]]  ;;  %v428_v3 = vld [vmem:[#allocation7 + $0x18] sm:$0xff]  ;;  %v89_v34 = vld [vmem:[#allocation8] sm:$0xff]  ;;  %v90_v36 = vld [vmem:[#allocation8 + $0x8] sm:$0xff]  ;;  %s363_s0 = smov [#allocation11]  }
  0x38   :  { %v144_v24 = vshrl.u32 %v143_v15, 7  ;;  %v149_v32 = vand.u32 127, %v143_v15  ;;  %v91_v39 = vld [vmem:[#allocation8 + $0x10] sm:$0xff]  ;;  %v92_v42 = vld [vmem:[#allocation8 + $0x18] sm:$0xff]  ;;  %v103_v43 = vsub.f32 %v422_v0, %v89_v34  ;;  %v104_v46 = vsub.f32 %v424_v1, %v90_v36  ;;  %s207_s26 = sshll.u32 %s363_s0, 4  ;;  %s364_s27 = smov [#allocation10]   ;;  %s208_s26 = int_to_ptr.vmem [resolvable:$true] %s207_s26 }
  0x39   :  { %v105_v50 = vsub.f32 %v426_v2, %v91_v39  ;;  %v106_v53 = vsub.f32 %v428_v3, %v92_v42  ;;  %s197_s28 = sshll.u32 %s364_s27, 4  ;;  %s304_s29 = scalar_lea.vmem %s208_s26, 128  ;;  %s198_s28 = int_to_ptr.vmem [resolvable:$true] %s197_s28 }
  0x3a   :  { %v145_v29 = vadd.s32 8, %v144_v24  ;;  %v146_v30 = vadd.s32 16, %v144_v24  ;;  %v147_v31 = vadd.s32 24, %v144_v24  ;;  %v150_v33 = vmul.u32 128, %v144_v24  ;;  %p305_p7 = scmp.ne.s32.totalorder %s208_s26, %s304_s29  ;;  %p309_p8 = scmp.lt.s32.totalorder %s208_s26, %s208_s26 }
  0x3b   :  { %p310_p9 = scmp.lt.s32.totalorder %s304_s29, %s304_s29 }
  0x3c   :  { %v430_v4 = vstv %s222_s23  ;;  %v98_v5 = vstv %s82_s22  ;;  %v151_v35 = vmul.u32 128, %v145_v29  ;;  %v152_v37 = vmul.u32 128, %v146_v30 }
  0x3d   :  { %v94_v6 = vmul.f32 %v430_v4, %v422_v0  ;;  %v95_v7 = vmul.f32 %v430_v4, %v424_v1  ;;  %v96_v8 = vmul.f32 %v430_v4, %v426_v2  ;;  %v97_v9 = vmul.f32 %v430_v4, %v428_v3  ;;  %p311_p10 = por %p310_p9, %p309_p8 }
  0x3e   :  { %v111_v14 = vstv %s223_s24  ;;  %v153_v40 = vmul.u32 128, %v147_v31  ;;  %v154_v44 = vadd.s32 %v150_v33, %v149_v32  ;;  %v155_v47 = vadd.s32 %v151_v35, %v149_v32 }
  0x3f   :  { %v99_v10 = vadd.f32 %v98_v5, %v94_v6  ;;  %v100_v11 = vadd.f32 %v98_v5, %v95_v7  ;;  %v101_v12 = vadd.f32 %v98_v5, %v96_v8  ;;  %v102_v13 = vadd.f32 %v98_v5, %v97_v9  ;;  %p312_p11 = pnand %p311_p10, %p305_p7 }
  0x40   :  { %v156_v51 = vadd.s32 %v152_v37, %v149_v32  ;;  %v157_v55 = vadd.s32 %v153_v40, %v149_v32  ;;  %v107_v57 = vmul.f32 %v103_v43, %v430_v4  ;;  %vm159_vm0 = vcmp.lt.s32.totalorder %v154_v44, %v158_v48 }
  0x41   :  { %v112_v16 = vmax.f32 %v99_v10, %v111_v14  ;;  %v113_v17 = vmax.f32 %v100_v11, %v111_v14  ;;  %v114_v18 = vmax.f32 %v101_v12, %v111_v14  ;;  %v115_v19 = vmax.f32 %v102_v13, %v111_v14 }
  0x42   :  { %v108_v60 = vmul.f32 %v104_v46, %v430_v4  ;;  %vm160_vm1 = vcmp.lt.s32.totalorder %v155_v47, %v158_v48  ;;  %v109_v0 = vmul.f32 %v105_v50, %v430_v4  ;;  %vm161_vm2 = vcmp.lt.s32.totalorder %v156_v51, %v158_v48 }
  0x43   :  { %v116_v20 = vsub.f32 %v112_v16, %v111_v14  ;;  %v117_v21 = vsub.f32 %v113_v17, %v111_v14  ;;  %v118_v22 = vsub.f32 %v114_v18, %v111_v14  ;;  %v119_v23 = vsub.f32 %v115_v19, %v111_v14 }
  0x44   :  { %232 = vrcp.f32 %v112_v16  ;;  %v110_v3 = vmul.f32 %v106_v53, %v430_v4  ;;  %vm162_vm3 = vcmp.lt.s32.totalorder %v157_v55, %v158_v48 }
  0x45   :  { %v120_v25 = vmul.f32 -0.0006, %v116_v20  ;;  %v121_v26 = vmul.f32 -0.0006, %v117_v21  ;;  %v122_v27 = vmul.f32 -0.0006, %v118_v22  ;;  %234 = vrcp.f32 %v113_v17 }
  0x46   :  { %v123_v28 = vmul.f32 -0.0006, %v119_v23  ;;  %236 = vrcp.f32 %v114_v18 }
  0x47   :  { %238 = vtanh.f32 %v120_v25 }
  0x48   :  { %240 = vtanh.f32 %v121_v26 }
  0x49   :  { %242 = vtanh.f32 %v122_v27 }
  0x4a   :  { %244 = vtanh.f32 %v123_v28 }
  0x4b   :  { %246 = vrcp.f32 %v115_v19 }
  0x4e   :  { %v233_v38 = vpop.eup %232 }
  0x4f   :  { %v235_v41 = vpop.eup %234 }
  0x50   :  { %v237_v45 = vpop.eup %236 }
  0x51   :  { %v239_v49 = vpop.eup %238 }
  0x52   :  { %v241_v52 = vpop.eup %240  ;;  %v128_v54 = vadd.f32 1.002002, %v239_v49 }
  0x53   :  { %v243_v56 = vpop.eup %242  ;;  %v129_v58 = vadd.f32 1.002002, %v241_v52 }
  0x54   :  { %v245_v59 = vpop.eup %244  ;;  %v130_v61 = vadd.f32 1.002002, %v243_v56  ;;  %v136_v62 = vmul.f32 %v233_v38, %v128_v54 }
  0x55   :  { %v247_v63 = vpop.eup %246  ;;  %v131_v1 = vadd.f32 1.002002, %v245_v59  ;;  %v137_v2 = vmul.f32 %v235_v41, %v129_v58 }
  0x56   :  { %v138_v5 = vmul.f32 %v237_v45, %v130_v61  ;;  %v163_v6 = vsel %vm159_vm0, %v136_v62, 0.0 }
  0x57   :  { %v139_v7 = vmul.f32 %v247_v63, %v131_v1  ;;  %v164_v8 = vsel %vm160_vm1, %v137_v2, 0.0  ;;  %v167_v9 = vmul.f32 %v163_v6, %v107_v57 }
  0x58   :  { %v165_v10 = vsel %vm161_vm2, %v138_v5, 0.0  ;;  %v168_v11 = vmul.f32 %v164_v8, %v108_v60  ;;  %v186_v12 = vmax.f32 %v163_v6, %v164_v8 }
  0x59   :  { %v166_v13 = vsel %vm162_vm3, %v139_v7, 0.0  ;;  %v169_v14 = vmul.f32 %v165_v10, %v109_v0  ;;  %v171_v15 = vmul.f32 %v167_v9, %v107_v57 }
  0x5a   :  { %v170_v16 = vmul.f32 %v166_v13, %v110_v3  ;;  %v172_v17 = vmul.f32 %v168_v11, %v108_v60  ;;  %v187_v18 = vmax.f32 %v165_v10, %v166_v13 }
  0x5b   :  { %v173_v4 = vmul.f32 %v169_v14, %v109_v0  ;;  %v175_v19 = vsel %vm159_vm0, %v171_v15, 0.0 }
  0x5c   :  { %v174_v20 = vmul.f32 %v170_v16, %v110_v3  ;;  %v176_v21 = vsel %vm160_vm1, %v172_v17, 0.0  ;;  %v188_v22 = vmax.f32 %v186_v12, %v187_v18 }
  0x5d   :  { %v177_v23 = vsel %vm161_vm2, %v173_v4, 0.0  ;;  %v180_v24 = vadd.f32 %v176_v21, %v175_v19 }
  0x5e   :  { %v178_v25 = vsel %vm162_vm3, %v174_v20, 0.0  ;;  %v189_v26 = vmax.f32 %v188_v22, 0.0 }
  0x5f   :  { %v181_v27 = vadd.f32 %v180_v24, %v177_v23 }
  0x60   :  { %190 = vst [vmem:[#allocation11] sm:$0xff] %v189_v26 }
  0x61   :  { %v182_v28 = vadd.f32 %v181_v27, %v178_v25 }
  0x62   :  { %315 = shalt.err (!%p312_p11)
}
  0x63   :  { %s316_s6 = scalar_lea.hbm %s488_s5, 128 }
  0x64   :  { %p317_p12 = scmp.ne.s32.totalorder %s488_s5, %s316_s6  ;;  %p320_p13 = scmp.lt.u32.totalorder %s316_s6, %s488_s5 }
  0x66   :  { %p322_p0 = pnand %p320_p13, %p317_p12 }
  0x68   :  { %325 = shalt.err (!%p322_p0)
}
  0x69   :  { %210 = dma.vmem_to_hbm [thread:$0]  %s208_s26, 128, %s488_s5, [#allocation12]   ;;  %184 = vst [vmem:[#allocation10] sm:$0xff] %v182_v28 }
  0x6a   :  { %s326_s13 = scalar_lea.vmem %s198_s28, 128  ;;  %p331_p2 = scmp.lt.s32.totalorder %s198_s28, %s198_s28 }
  0x6b   :  { %p327_p1 = scmp.ne.s32.totalorder %s198_s28, %s326_s13  ;;  %p332_p3 = scmp.lt.s32.totalorder %s326_s13, %s326_s13 }
  0x6d   :  { %p333_p4 = por %p332_p3, %p331_p2 }
  0x6f   :  { %p334_p5 = pnand %p333_p4, %p327_p1 }
  0x71   :  { %337 = shalt.err (!%p334_p5)
}
  0x72   :  { %s338_s16 = scalar_lea.hbm %s487_s4, 128 }
  0x73   :  { %p339_p6 = scmp.ne.s32.totalorder %s487_s4, %s338_s16  ;;  %p342_p7 = scmp.lt.u32.totalorder %s338_s16, %s487_s4 }
  0x75   :  { %p344_p8 = pnand %p342_p7, %p339_p6 }
  0x77   :  { %347 = shalt.err (!%p344_p8)
}
  0x78   :  { %200 = dma.vmem_to_hbm [thread:$0]  %s198_s28, 128, %s487_s4, [#allocation5]  }
  0x79   :  { %354 = dma.done.wait [#allocation5], 128  }
  0x7a   :  { %355 = vsyncadd [#allocation5], 4294967168 }
  0x7b   :  { %356 = dma.done.wait [#allocation12], 128  }
  0x7c   :  { %357 = vsyncadd [#allocation12], 4294967168 }
  0x7d   :  { %217 = vsyncpa [#allocation4], 1 }
  0x7e   :  { %218 = vsyncpa [#allocation9], 1 }
  0x7f   :  { %219 = vsyncpa [#allocation5], 1 }
  0x80   :  { %220 = vsyncpa [#allocation12], 1 }
  0x81   :  { %221 = vsyncpa [#allocation6], 1 }

</bundles_post_ra>
